<compile_context>
chip_gen: v7x
topology: tpu7x:2x2x1
jax: 0.10.0
libtpu: 0.0.40
codegen_flags: <defaults>
</compile_context>

<pallas_src>
import jax
import jax.numpy as jnp
from jax.experimental import pallas as pl
from jax.experimental.pallas import tpu as pltpu

INPUT_DIM = 32
HIDDEN = 512
OUT = 3
OUT_PAD = 128        # lane-dense padded output width
HCHUNK = 128         # hidden-dim chunk size inside the kernel
MAX_TB = 1024        # batch tile cap: fits comfortably in scoped VMEM on v5e/v6e/v7x


def _round_up(n, m):
    return ((n + m - 1) // m) * m


def _mlp_kernel(x_ref, w1_ref, b1_ref, w2_ref, b2_ref, o_ref):
    # x: [TB, D], w1: [D, 512], b1: [1, 512], w2: [512, 128], b2: [1, 128]
    x = x_ref[...]
    tb = x.shape[0]
    acc = jnp.zeros((tb, OUT_PAD), jnp.float32)

    # Chunk the hidden dimension: fc1 column block -> bias -> ReLU -> fc2 row block.
    # Keeps the live intermediate at [TB, 128] and feeds the MXU back-to-back.
    # Dropout(p=0.5) is identity in eval/inference mode (matches model.eval()).
    # TODO(synk): train-mode stochastic dropout would use pltpu.prng_random_bits
    #             plus a 1/(1-p) rescale between the two matmuls.
    for c in range(HIDDEN // HCHUNK):
        lo = c * HCHUNK
        hi = lo + HCHUNK
        h_c = jnp.dot(x, w1_ref[:, lo:hi], preferred_element_type=jnp.float32)
        h_c = jnp.maximum(h_c + b1_ref[:, lo:hi], 0.0)
        acc = acc + jnp.dot(h_c, w2_ref[lo:hi, :], preferred_element_type=jnp.float32)

    o_ref[...] = (acc + b2_ref[...]).astype(o_ref.dtype)


def sentiment_forward(x, w1, b1, w2, b2, *, tb=None):
    """x: [B, input_dim] f32. Returns [B, 3] f32 logits."""
    B, D = x.shape
    assert w1.shape == (D, HIDDEN)
    assert w2.shape == (HIDDEN, OUT)

    # Lane-pad fc2 weights/bias to 128 output columns (zero-filled).
    w2_p = jnp.zeros((HIDDEN, OUT_PAD), w2.dtype).at[:, :OUT].set(w2)
    b2_p = jnp.zeros((1, OUT_PAD), b2.dtype).at[:, :OUT].set(b2)
    b1_2d = b1.reshape(1, HIDDEN)

    # Batch tile: multiple of 8 (f32 sublane), capped so the working set
    # (x tile + out tile + [TB,128] intermediates, double-buffered) stays well
    # under the 16 MiB v5e scoped-VMEM default.
    if tb is None:
        tb = min(MAX_TB, _round_up(B, 8))
    b_pad = _round_up(B, tb)
    if b_pad != B:
        x = jnp.pad(x, ((0, b_pad - B), (0, 0)))

    grid = (b_pad // tb,)

    flops = 2 * b_pad * (D * HIDDEN + HIDDEN * OUT_PAD)
    bytes_accessed = 4 * (
        b_pad * D                      # x read
        + D * HIDDEN + HIDDEN          # W1 + b1
        + HIDDEN * OUT_PAD + OUT_PAD   # W2 + b2 (padded)
        + b_pad * OUT_PAD              # output write
    )

    # TODO(synk): for very large serving batches, casting x/W1 to bf16 on the
    #             HBM path (f32 accumulation kept) roughly halves the dominant
    #             HBM read on v6e/v7x, at the cost of exact f32 parity.
    out = pl.pallas_call(
        _mlp_kernel,
        out_shape=jax.ShapeDtypeStruct((b_pad, OUT_PAD), jnp.float32),
        grid=grid,
        in_specs=[
            pl.BlockSpec((tb, D), lambda i: (i, 0)),            # x: tiled over batch
            pl.BlockSpec((D, HIDDEN), lambda i: (0, 0)),        # W1: VMEM-resident
            pl.BlockSpec((1, HIDDEN), lambda i: (0, 0)),        # b1: VMEM-resident
            pl.BlockSpec((HIDDEN, OUT_PAD), lambda i: (0, 0)),  # W2 (padded): resident
            pl.BlockSpec((1, OUT_PAD), lambda i: (0, 0)),       # b2 (padded): resident
        ],
        out_specs=pl.BlockSpec((tb, OUT_PAD), lambda i: (i, 0)),
        compiler_params=pltpu.CompilerParams(
            dimension_semantics=("parallel",),
        ),
        cost_estimate=pl.CostEstimate(
            flops=flops, transcendentals=0, bytes_accessed=bytes_accessed),
    )(x, w1, b1_2d, w2_p, b2_p)

    return out[:B, :OUT]


def init_params(key, input_dim):
    """Deterministic init mimicking PyTorch nn.Linear default (U(-k, k), k=1/sqrt(fan_in))."""
    k1, k2, k3, k4 = jax.random.split(key, 4)
    bound1 = 1.0 / jnp.sqrt(jnp.float32(input_dim))
    bound2 = 1.0 / jnp.sqrt(jnp.float32(HIDDEN))
    w1 = jax.random.uniform(k1, (input_dim, HIDDEN), jnp.float32, -bound1, bound1)
    b1 = jax.random.uniform(k2, (HIDDEN,), jnp.float32, -bound1, bound1)
    w2 = jax.random.uniform(k3, (HIDDEN, OUT), jnp.float32, -bound2, bound2)
    b2 = jax.random.uniform(k4, (OUT,), jnp.float32, -bound2, bound2)
    return w1, b1, w2, b2


if __name__ == "__main__":
    key = jax.random.PRNGKey(0)
    kx, kp = jax.random.split(key)
    B = 2
    x = jax.random.normal(kx, (B, INPUT_DIM), jnp.float32)
    w1, b1, w2, b2 = init_params(kp, INPUT_DIM)

    out = sentiment_forward(x, w1, b1, w2, b2)
    out = jax.block_until_ready(out)

    # Reference check in plain JAX (eval-mode dropout == identity).
    ref = jnp.maximum(x @ w1 + b1, 0.0) @ w2 + b2
    assert out.shape == (B, OUT)
    assert jnp.allclose(out, ref, atol=1e-5, rtol=1e-5)
    print("KERNEL_OK")
</pallas_src>

<mosaic_0001>
module attributes {stable_mosaic.version = 11 : i64} {
  func.func @_mlp_kernel(%arg0: i32, %arg1: memref<8x32xf32, #tpu.memory_space<vmem>>, %arg2: memref<32x512xf32, #tpu.memory_space<vmem>>, %arg3: memref<1x512xf32, #tpu.memory_space<vmem>>, %arg4: memref<512x128xf32, #tpu.memory_space<vmem>>, %arg5: memref<1x128xf32, #tpu.memory_space<vmem>>, %arg6: memref<8x128xf32, #tpu.memory_space<vmem>>) attributes {dimension_semantics = [#tpu.dimension_semantics<parallel>], iteration_bounds = array<i64: 1>, scalar_prefetch = 0 : i64, scratch_operands = 0 : i64, tpu.core_type = #tpu.core_type<tc>, window_params = [{transform_indices = @transform_0, window_bounds = array<i64: 8, 32>}, {pipeline_mode = #tpu.pipeline_mode<synchronous>, transform_indices = @transform_1, window_bounds = array<i64: 32, 512>}, {pipeline_mode = #tpu.pipeline_mode<synchronous>, transform_indices = @transform_2, window_bounds = array<i64: 1, 512>}, {pipeline_mode = #tpu.pipeline_mode<synchronous>, transform_indices = @transform_3, window_bounds = array<i64: 512, 128>}, {pipeline_mode = #tpu.pipeline_mode<synchronous>, transform_indices = @transform_4, window_bounds = array<i64: 1, 128>}, {transform_indices = @transform_5, window_bounds = array<i64: 8, 128>}]} {
    %c0 = arith.constant 0 : index
    %c0_0 = arith.constant 0 : index
    %0 = vector.load %arg1[%c0, %c0_0] : memref<8x32xf32, #tpu.memory_space<vmem>>, vector<8x32xf32>
    %cst = arith.constant 0.000000e+00 : f32
    %1 = vector.broadcast %cst : f32 to vector<8x128xf32>
    %c0_1 = arith.constant 0 : index
    %c0_2 = arith.constant 0 : index
    %2 = vector.load %arg2[%c0_1, %c0_2] : memref<32x512xf32, #tpu.memory_space<vmem>>, vector<32x128xf32>
    %cst_3 = arith.constant dense<0.000000e+00> : vector<8x128xf32>
    %3 = tpu.matmul %0, %2, %cst_3 {dimension_numbers = #tpu.dot_dimension_numbers<[1], [0], [0], [1], [0, 0, 1, 1], [], []>} : vector<8x32xf32>, vector<32x128xf32>, vector<8x128xf32> -> vector<8x128xf32>
    %c0_4 = arith.constant 0 : index
    %c0_5 = arith.constant 0 : index
    %4 = vector.load %arg3[%c0_4, %c0_5] : memref<1x512xf32, #tpu.memory_space<vmem>>, vector<1x128xf32>
    %5 = vector.broadcast %4 : vector<1x128xf32> to vector<8x128xf32>
    %6 = arith.addf %3, %5 : vector<8x128xf32>
    %cst_6 = arith.constant 0.000000e+00 : f32
    %7 = vector.broadcast %cst_6 : f32 to vector<8x128xf32>
    %8 = arith.maximumf %6, %7 : vector<8x128xf32>
    %c0_7 = arith.constant 0 : index
    %c0_8 = arith.constant 0 : index
    %9 = vector.load %arg4[%c0_7, %c0_8] : memref<512x128xf32, #tpu.memory_space<vmem>>, vector<128x128xf32>
    %cst_9 = arith.constant dense<0.000000e+00> : vector<8x128xf32>
    %10 = tpu.matmul %8, %9, %cst_9 {dimension_numbers = #tpu.dot_dimension_numbers<[1], [0], [0], [1], [0, 0, 1, 1], [], []>} : vector<8x128xf32>, vector<128x128xf32>, vector<8x128xf32> -> vector<8x128xf32>
    %11 = arith.addf %1, %10 : vector<8x128xf32>
    %c0_10 = arith.constant 0 : index
    %c128 = arith.constant 128 : index
    %12 = vector.load %arg2[%c0_10, %c128] : memref<32x512xf32, #tpu.memory_space<vmem>>, vector<32x128xf32>
    %cst_11 = arith.constant dense<0.000000e+00> : vector<8x128xf32>
    %13 = tpu.matmul %0, %12, %cst_11 {dimension_numbers = #tpu.dot_dimension_numbers<[1], [0], [0], [1], [0, 0, 1, 1], [], []>} : vector<8x32xf32>, vector<32x128xf32>, vector<8x128xf32> -> vector<8x128xf32>
    %c0_12 = arith.constant 0 : index
    %c128_13 = arith.constant 128 : index
    %14 = vector.load %arg3[%c0_12, %c128_13] : memref<1x512xf32, #tpu.memory_space<vmem>>, vector<1x128xf32>
    %15 = vector.broadcast %14 : vector<1x128xf32> to vector<8x128xf32>
    %16 = arith.addf %13, %15 : vector<8x128xf32>
    %cst_14 = arith.constant 0.000000e+00 : f32
    %17 = vector.broadcast %cst_14 : f32 to vector<8x128xf32>
    %18 = arith.maximumf %16, %17 : vector<8x128xf32>
    %c128_15 = arith.constant 128 : index
    %c0_16 = arith.constant 0 : index
    %19 = vector.load %arg4[%c128_15, %c0_16] : memref<512x128xf32, #tpu.memory_space<vmem>>, vector<128x128xf32>
    %cst_17 = arith.constant dense<0.000000e+00> : vector<8x128xf32>
    %20 = tpu.matmul %18, %19, %cst_17 {dimension_numbers = #tpu.dot_dimension_numbers<[1], [0], [0], [1], [0, 0, 1, 1], [], []>} : vector<8x128xf32>, vector<128x128xf32>, vector<8x128xf32> -> vector<8x128xf32>
    %21 = arith.addf %11, %20 : vector<8x128xf32>
    %c0_18 = arith.constant 0 : index
    %c256 = arith.constant 256 : index
    %22 = vector.load %arg2[%c0_18, %c256] : memref<32x512xf32, #tpu.memory_space<vmem>>, vector<32x128xf32>
    %cst_19 = arith.constant dense<0.000000e+00> : vector<8x128xf32>
    %23 = tpu.matmul %0, %22, %cst_19 {dimension_numbers = #tpu.dot_dimension_numbers<[1], [0], [0], [1], [0, 0, 1, 1], [], []>} : vector<8x32xf32>, vector<32x128xf32>, vector<8x128xf32> -> vector<8x128xf32>
    %c0_20 = arith.constant 0 : index
    %c256_21 = arith.constant 256 : index
    %24 = vector.load %arg3[%c0_20, %c256_21] : memref<1x512xf32, #tpu.memory_space<vmem>>, vector<1x128xf32>
    %25 = vector.broadcast %24 : vector<1x128xf32> to vector<8x128xf32>
    %26 = arith.addf %23, %25 : vector<8x128xf32>
    %cst_22 = arith.constant 0.000000e+00 : f32
    %27 = vector.broadcast %cst_22 : f32 to vector<8x128xf32>
    %28 = arith.maximumf %26, %27 : vector<8x128xf32>
    %c256_23 = arith.constant 256 : index
    %c0_24 = arith.constant 0 : index
    %29 = vector.load %arg4[%c256_23, %c0_24] : memref<512x128xf32, #tpu.memory_space<vmem>>, vector<128x128xf32>
    %cst_25 = arith.constant dense<0.000000e+00> : vector<8x128xf32>
    %30 = tpu.matmul %28, %29, %cst_25 {dimension_numbers = #tpu.dot_dimension_numbers<[1], [0], [0], [1], [0, 0, 1, 1], [], []>} : vector<8x128xf32>, vector<128x128xf32>, vector<8x128xf32> -> vector<8x128xf32>
    %31 = arith.addf %21, %30 : vector<8x128xf32>
    %c0_26 = arith.constant 0 : index
    %c384 = arith.constant 384 : index
    %32 = vector.load %arg2[%c0_26, %c384] : memref<32x512xf32, #tpu.memory_space<vmem>>, vector<32x128xf32>
    %cst_27 = arith.constant dense<0.000000e+00> : vector<8x128xf32>
    %33 = tpu.matmul %0, %32, %cst_27 {dimension_numbers = #tpu.dot_dimension_numbers<[1], [0], [0], [1], [0, 0, 1, 1], [], []>} : vector<8x32xf32>, vector<32x128xf32>, vector<8x128xf32> -> vector<8x128xf32>
    %c0_28 = arith.constant 0 : index
    %c384_29 = arith.constant 384 : index
    %34 = vector.load %arg3[%c0_28, %c384_29] : memref<1x512xf32, #tpu.memory_space<vmem>>, vector<1x128xf32>
    %35 = vector.broadcast %34 : vector<1x128xf32> to vector<8x128xf32>
    %36 = arith.addf %33, %35 : vector<8x128xf32>
    %cst_30 = arith.constant 0.000000e+00 : f32
    %37 = vector.broadcast %cst_30 : f32 to vector<8x128xf32>
    %38 = arith.maximumf %36, %37 : vector<8x128xf32>
    %c384_31 = arith.constant 384 : index
    %c0_32 = arith.constant 0 : index
    %39 = vector.load %arg4[%c384_31, %c0_32] : memref<512x128xf32, #tpu.memory_space<vmem>>, vector<128x128xf32>
    %cst_33 = arith.constant dense<0.000000e+00> : vector<8x128xf32>
    %40 = tpu.matmul %38, %39, %cst_33 {dimension_numbers = #tpu.dot_dimension_numbers<[1], [0], [0], [1], [0, 0, 1, 1], [], []>} : vector<8x128xf32>, vector<128x128xf32>, vector<8x128xf32> -> vector<8x128xf32>
    %41 = arith.addf %31, %40 : vector<8x128xf32>
    %c0_34 = arith.constant 0 : index
    %c0_35 = arith.constant 0 : index
    %42 = vector.load %arg5[%c0_34, %c0_35] : memref<1x128xf32, #tpu.memory_space<vmem>>, vector<1x128xf32>
    %43 = vector.broadcast %42 : vector<1x128xf32> to vector<8x128xf32>
    %44 = arith.addf %41, %43 : vector<8x128xf32>
    %c0_36 = arith.constant 0 : index
    %c0_37 = arith.constant 0 : index
    %45 = vector.load %arg6[%c0_36, %c0_37] : memref<8x128xf32, #tpu.memory_space<vmem>>, vector<8x128xf32>
    tpu.vector_store %arg6[%c0_36, %c0_37], %44 {strides = array<i32>} : memref<8x128xf32, #tpu.memory_space<vmem>>, vector<8x128xf32>,
    return
  }
  func.func @transform_0(%arg0: i32) -> (i32, i32) {
    %c0_i32 = arith.constant 0 : i32
    %c0_i32_0 = arith.constant 0 : i32
    return %arg0, %c0_i32 : i32, i32
  }
  func.func @transform_1(%arg0: i32) -> (i32, i32) {
    %c0_i32 = arith.constant 0 : i32
    %c0_i32_0 = arith.constant 0 : i32
    %c0_i32_1 = arith.constant 0 : i32
    return %c0_i32, %c0_i32_0 : i32, i32
  }
  func.func @transform_2(%arg0: i32) -> (i32, i32) {
    %c0_i32 = arith.constant 0 : i32
    %c0_i32_0 = arith.constant 0 : i32
    %c0_i32_1 = arith.constant 0 : i32
    return %c0_i32, %c0_i32_0 : i32, i32
  }
  func.func @transform_3(%arg0: i32) -> (i32, i32) {
    %c0_i32 = arith.constant 0 : i32
    %c0_i32_0 = arith.constant 0 : i32
    %c0_i32_1 = arith.constant 0 : i32
    return %c0_i32, %c0_i32_0 : i32, i32
  }
  func.func @transform_4(%arg0: i32) -> (i32, i32) {
    %c0_i32 = arith.constant 0 : i32
    %c0_i32_0 = arith.constant 0 : i32
    %c0_i32_1 = arith.constant 0 : i32
    return %c0_i32, %c0_i32_0 : i32, i32
  }
  func.func @transform_5(%arg0: i32) -> (i32, i32) {
    %c0_i32 = arith.constant 0 : i32
    %c0_i32_0 = arith.constant 0 : i32
    return %arg0, %c0_i32 : i32, i32
  }
}

</mosaic_0001>

<bundles_post_ra>
// kernel: tpu_custom_call.1
= control target key start
LH: loop header
LB: loop body
LE: loop exit
PB: predicated region body
PF: predicated region fallthrough
CT: control target
= control target key end

     0   :  { %10 = vsyncpa [#allocation3], 0  ;;  %s1440_s0 = inlined_call_operand.hbm [shape: f32[8,32], index: 0, kind: input, shape index: {}]   ;;  %s1441_s1 = inlined_call_operand.hbm [shape: f32[32,512], index: 1, kind: input, shape index: {}]   ;;  %s1442_s2 = inlined_call_operand.vmem [shape: f32[1,512], index: 2, kind: input, shape index: {}]   ;;  %s1443_s3 = inlined_call_operand.hbm [shape: f32[512,128], index: 3, kind: input, shape index: {}]   ;;  %s1444_s4 = inlined_call_operand.vmem [shape: f32[1,128], index: 4, kind: input, shape index: {}]   ;;  %s1445_s5 = inlined_call_operand.hbm [shape: f32[8,128], index: 5, kind: output, shape index: {}]  }
   0x1   :  { %11 = vsyncpa [#allocation6], 0 }
   0x2   :  { %12 = vsyncpa [#allocation4], 0  ;;  %s1270_s18 = smov [#allocation5]   ;;  %s1176_s22 = scalar_lea.hbm %s1441_s1, 2048 }
   0x3   :  { %s28_s19 = sshll.u32 %s1270_s18, 4  ;;  %p1177_p0 = scmp.ne.s32.totalorder %s1441_s1, %s1176_s22  ;;  %s29_s19 = int_to_ptr.vmem [resolvable:$true] %s28_s19 }
   0x4   :  { %p1180_p1 = scmp.lt.u32.totalorder %s1176_s22, %s1441_s1 }
   0x6   :  { %p1182_p2 = pnand %p1180_p1, %p1177_p0 }
   0x8   :  { %1185 = shalt.err (!%p1182_p2)
}
   0x9   :  { %s1186_s27 = scalar_lea.vmem %s29_s19, 2048  ;;  %p1191_p4 = scmp.lt.s32.totalorder %s29_s19, %s29_s19 }
   0xa   :  { %p1187_p3 = scmp.ne.s32.totalorder %s29_s19, %s1186_s27  ;;  %p1192_p5 = scmp.lt.s32.totalorder %s1186_s27, %s1186_s27 }
   0xc   :  { %p1193_p6 = por %p1192_p5, %p1191_p4 }
   0xe   :  { %p1194_p7 = pnand %p1193_p6, %p1187_p3 }
  0x10   :  { %1197 = shalt.err (!%p1194_p7)
}
  0x11   :  { %s1271_s28 = smov 512   ;;  %s1272_s29 = smov 32  }
  0x12   :  { %34 = dma.hbm_to_vmem [thread:$0]  %s1441_s1, 2048, %s29_s19, [#allocation6], %s1271_s28, %s1271_s28, %s1272_s29  }
  0x13   :  { %s1273_s7 = smov [#allocation2]   ;;  %s1274_s9 = smov [#allocation7]  }
  0x14   :  { %s19_s8 = sshll.u32 %s1273_s7, 4  ;;  %s42_s10 = sshll.u32 %s1274_s9, 4  ;;  %s20_s8 = int_to_ptr.vmem [resolvable:$true] %s19_s8  ;;  %s43_s10 = int_to_ptr.vmem [resolvable:$true] %s42_s10 }
  0x15   :  { %s1198_s13 = scalar_lea.hbm %s1440_s0, 128 }
  0x16   :  { %p1199_p8 = scmp.ne.s32.totalorder %s1440_s0, %s1198_s13  ;;  %p1202_p9 = scmp.lt.u32.totalorder %s1198_s13, %s1440_s0 }
  0x18   :  { %p1204_p10 = pnand %p1202_p9, %p1199_p8 }
  0x1a   :  { %1207 = shalt.err (!%p1204_p10)
}
  0x1b   :  { %s1208_s1 = scalar_lea.vmem %s20_s8, 128  ;;  %p1213_p12 = scmp.lt.s32.totalorder %s20_s8, %s20_s8 }
  0x1c   :  { %p1209_p11 = scmp.ne.s32.totalorder %s20_s8, %s1208_s1  ;;  %p1214_p13 = scmp.lt.s32.totalorder %s1208_s1, %s1208_s1 }
  0x1e   :  { %p1215_p0 = por %p1214_p13, %p1213_p12 }
  0x20   :  { %p1216_p1 = pnand %p1215_p0, %p1209_p11 }
  0x22   :  { %1219 = shalt.err (!%p1216_p1)
}
  0x23   :  { %22 = dma.hbm_to_vmem [thread:$0]  %s1440_s0, 128, %s20_s8, [#allocation3]  }
  0x24   :  { %s1220_s22 = scalar_lea.hbm %s1443_s3, 8192 }
  0x25   :  { %p1221_p2 = scmp.ne.s32.totalorder %s1443_s3, %s1220_s22  ;;  %p1224_p3 = scmp.lt.u32.totalorder %s1220_s22, %s1443_s3 }
  0x27   :  { %p1226_p4 = pnand %p1224_p3, %p1221_p2 }
  0x29   :  { %1229 = shalt.err (!%p1226_p4)
}
  0x2a   :  { %s1230_s27 = scalar_lea.vmem %s43_s10, 8192  ;;  %p1235_p6 = scmp.lt.s32.totalorder %s43_s10, %s43_s10 }
  0x2b   :  { %p1231_p5 = scmp.ne.s32.totalorder %s43_s10, %s1230_s27  ;;  %p1236_p7 = scmp.lt.s32.totalorder %s1230_s27, %s1230_s27 }
  0x2d   :  { %p1237_p8 = por %p1236_p7, %p1235_p6 }
  0x2f   :  { %p1238_p9 = pnand %p1237_p8, %p1231_p5 }
  0x31   :  { %1241 = shalt.err (!%p1238_p9)
}
  0x32   :  { %s1275_s0 = smov 128   ;;  %s1276_s28 = smov 8  }
  0x33   :  { %48 = dma.hbm_to_vmem [thread:$0]  %s1443_s3, 8192, %s43_s10, [#allocation6], %s1275_s0, %s1275_s0, %s1276_s28  }
  0x34   :  { %1264 = dma.done.wait [#allocation3], 128  }
  0x35   :  { %1265 = vsyncadd [#allocation3], 4294967168 }
  0x36   :  { %1266 = dma.done.wait [#allocation6], 10240  }
  0x37   :  { %1267 = vsyncadd [#allocation6], 4294957056  ;;  %v1277_v0 = vmov 0.0|0.0   ;;  %vm1278_vm0 = vmmov 0   ;;  %v1279_v1 = vmov 0.0   ;;  %v61_v2 = vld [vmem:[#allocation5] sm:$0xff] }
  0x38   :  { %1045 = vmatprep.subr.bf16.mxu1 %v1277_v0  ;;  %869 = vmatprep.mubr.msk.f32.mxu1 %vm1278_vm0, %v1279_v1  ;;  %v62_v3 = vld [vmem:[#allocation5 + $0x20] sm:$0xff]  ;;  %v163_v8 = vld [vmem:[#allocation5 + $0x8] sm:$0xff]  ;;  %v247_v13 = vld [vmem:[#allocation7 + $0x90] sm:$0xff]  ;;  %vm72_vm1 = vcmask 261120   ;;  %s1280_s15 = smov [#allocation8]  }
  0x39   :  { %1057 = vmatprep.subr.bf16.mxu0 %v1277_v0  ;;  %915 = vmatprep.mubr.msk.f32.mxu0 %vm1278_vm0, %v1279_v1  ;;  %v63_v4 = vld [vmem:[#allocation5 + $0x40] sm:$0xff]  ;;  %v1046_v5 = vpack.c.bf16 %v62_v3, %v61_v2  ;;  %v164_v9 = vld [vmem:[#allocation5 + $0x28] sm:$0xff]  ;;  %v248_v14 = vld [vmem:[#allocation7 + $0x98] sm:$0xff]  ;;  %s754_s16 = sshll.u32 %s1280_s15, 4  ;;  %s755_s16 = int_to_ptr.vmem [resolvable:$true] %s754_s16 }
  0x3a   :  { %v64_v6 = vld [vmem:[#allocation5 + $0x60] sm:$0xff]  ;;  %v246_v11 = vld [vmem:[#allocation7 + $0x88] sm:$0xff]  ;;  %v1354_v15 = vld [vmem:[#allocation2] sm:$0xff]  ;;  %v1052_v16 = vpack.c.bf16 %v164_v9, %v163_v8  ;;  %v1061_v19 = vpack.c.bf16 %v248_v14, %v247_v13  ;;  %p1247_p11 = scmp.lt.s32.totalorder %s755_s16, %s755_s16 }
  0x3b   :  { %1047 = vmatpush3.bf16.msra.mxu1 %v1046_v5  ;;  %v1049_v7 = vpack.c.bf16 %v64_v6, %v63_v4  ;;  %v245_v10 = vld [vmem:[#allocation7 + $0x80] sm:$0xff]  ;;  %v165_v17 = vld [vmem:[#allocation5 + $0x48] sm:$0xff]  ;;  %v251_v26 = vld [vmem:[#allocation7 + $0xb0] sm:$0xff] }
  0x3c   :  { %1048 = vmatprep.subr.bf16.mxu1 %v1277_v0  ;;  %v1058_v12 = vpack.c.bf16 %v246_v11, %v245_v10  ;;  %v166_v18 = vld [vmem:[#allocation5 + $0x68] sm:$0xff]  ;;  %v249_v20 = vld [vmem:[#allocation7 + $0xa0] sm:$0xff]  ;;  %v252_v27 = vld [vmem:[#allocation7 + $0xb8] sm:$0xff] }
  0x3d   :  { %v250_v21 = vld [vmem:[#allocation7 + $0xa8] sm:$0xff]  ;;  %v1055_v22 = vpack.c.bf16 %v166_v18, %v165_v17  ;;  %v147_v23 = vld [vmem:[#allocation7] sm:$0xff]  ;;  %v149_v29 = vld [vmem:[#allocation7 + $0x10] sm:$0xff]  ;;  %v1067_v31 = vpack.c.bf16 %v252_v27, %v251_v26 }
  0x3e   :  { %1059 = vmatpush3.bf16.msra.mxu0 %v1058_v12  ;;  %v148_v24 = vld [vmem:[#allocation7 + $0x8] sm:$0xff]  ;;  %v1064_v25 = vpack.c.bf16 %v250_v21, %v249_v20  ;;  %v150_v30 = vld [vmem:[#allocation7 + $0x18] sm:$0xff]  ;;  %v253_v32 = vld [vmem:[#allocation7 + $0xc0] sm:$0xff] }
  0x3f   :  { %1050 = vmatpush3.bf16.msra.mxu1 %v1049_v7  ;;  %1060 = vmatprep.subr.bf16.mxu0 %v1277_v0  ;;  %v1082_v28 = vpack.c.bf16 %v148_v24, %v147_v23  ;;  %v254_v33 = vld [vmem:[#allocation7 + $0xc8] sm:$0xff]  ;;  %v1085_v34 = vpack.c.bf16 %v150_v30, %v149_v29  ;;  %v151_v35 = vld [vmem:[#allocation7 + $0x20] sm:$0xff]  ;;  %v153_v39 = vld [vmem:[#allocation7 + $0x30] sm:$0xff] }
  0x40   :  { %1051 = vmatprep.subr.bf16.mxu1 %v1277_v0  ;;  %v152_v36 = vld [vmem:[#allocation7 + $0x28] sm:$0xff]  ;;  %v1070_v37 = vpack.c.bf16 %v254_v33, %v253_v32  ;;  %v154_v40 = vld [vmem:[#allocation7 + $0x38] sm:$0xff]  ;;  %v155_v42 = vld [vmem:[#allocation7 + $0x40] sm:$0xff] }
  0x41   :  { %v1088_v38 = vpack.c.bf16 %v152_v36, %v151_v35  ;;  %v1091_v41 = vpack.c.bf16 %v154_v40, %v153_v39  ;;  %v156_v43 = vld [vmem:[#allocation7 + $0x48] sm:$0xff]  ;;  %v157_v45 = vld [vmem:[#allocation7 + $0x50] sm:$0xff]  ;;  %v158_v46 = vld [vmem:[#allocation7 + $0x58] sm:$0xff] }
  0x42   :  { %870 = vmatmul.mubr.msk.f32.vlgmr.msra.gmra.mrb[0].mxu1 %vm72_vm1, %v1354_v15  ;;  %1062 = vmatpush3.bf16.msra.mxu0 %v1061_v19  ;;  %v1094_v44 = vpack.c.bf16 %v156_v43, %v155_v42  ;;  %v1097_v47 = vpack.c.bf16 %v158_v46, %v157_v45  ;;  %v159_v48 = vld [vmem:[#allocation7 + $0x60] sm:$0xff]  ;;  %v160_v49 = vld [vmem:[#allocation7 + $0x68] sm:$0xff]  ;;  %v255_v51 = vld [vmem:[#allocation7 + $0xd0] sm:$0xff] }
  0x43   :  { %1053 = vmatpush3.bf16.msra.mxu1 %v1052_v16  ;;  %880 = vmatprep.mubr.msk.f32.mxu1 %vm1278_vm0, %v1279_v1  ;;  %v1100_v50 = vpack.c.bf16 %v160_v49, %v159_v48  ;;  %v256_v52 = vld [vmem:[#allocation7 + $0xd8] sm:$0xff]  ;;  %v161_v54 = vld [vmem:[#allocation7 + $0x70] sm:$0xff]  ;;  %v257_v57 = vld [vmem:[#allocation7 + $0xe0] sm:$0xff] }
  0x44   :  { %1054 = vmatprep.subr.bf16.mxu1 %v1277_v0  ;;  %1063 = vmatprep.subr.bf16.mxu0 %v1277_v0  ;;  %v1073_v53 = vpack.c.bf16 %v256_v52, %v255_v51  ;;  %v162_v55 = vld [vmem:[#allocation7 + $0x78] sm:$0xff]  ;;  %v258_v58 = vld [vmem:[#allocation7 + $0xe8] sm:$0xff]  ;;  %v259_v60 = vld [vmem:[#allocation7 + $0xf0] sm:$0xff] }
  0x45   :  { %v1103_v56 = vpack.c.bf16 %v162_v55, %v161_v54  ;;  %v1076_v59 = vpack.c.bf16 %v258_v58, %v257_v57  ;;  %v260_v61 = vld [vmem:[#allocation7 + $0xf8] sm:$0xff]  ;;  %v483_v2 = vld [vmem:[#allocation7 + $0x100] sm:$0xff]  ;;  %v484_v3 = vld [vmem:[#allocation7 + $0x108] sm:$0xff] }
  0x46   :  { %1065 = vmatpush3.bf16.msra.mxu0 %v1064_v25  ;;  %v1079_v62 = vpack.c.bf16 %v260_v61, %v259_v60  ;;  %v764_v63 = vld [vmem:[%s1442_s2] ss:$0 sm:$0xff]  ;;  %v1112_v7 = vpack.c.bf16 %v484_v3, %v483_v2  ;;  %v485_v9 = vld [vmem:[#allocation7 + $0x110] sm:$0xff]  ;;  %v766_v11 = vld [vmem:[%s1442_s2 + $0x1] ss:$0 sm:$0xff] }
  0x47   :  { %1056 = vmatpush3.bf16.msra.mxu1 %v1055_v22  ;;  %1066 = vmatprep.subr.bf16.mxu0 %v1277_v0  ;;  %v486_v10 = vld [vmem:[#allocation7 + $0x118] sm:$0xff]  ;;  %v401_v13 = vld [vmem:[#allocation5 + $0x10] sm:$0xff]  ;;  %v487_v17 = vld [vmem:[#allocation7 + $0x120] sm:$0xff] }
  0x48   :  { %1081 = vmatprep.subr.bf16.mxu1 %v1277_v0  ;;  %v1115_v12 = vpack.c.bf16 %v486_v10, %v485_v9  ;;  %v402_v14 = vld [vmem:[#allocation5 + $0x30] sm:$0xff]  ;;  %v488_v18 = vld [vmem:[#allocation7 + $0x128] sm:$0xff]  ;;  %v570_v27 = vld [vmem:[#allocation5 + $0x18] sm:$0xff] }
  0x49   :  { %v1106_v21 = vpack.c.bf16 %v402_v14, %v401_v13  ;;  %v403_v23 = vld [vmem:[#allocation5 + $0x50] sm:$0xff]  ;;  %v1118_v25 = vpack.c.bf16 %v488_v18, %v487_v17  ;;  %v572_v30 = vld [vmem:[#allocation5 + $0x58] sm:$0xff]  ;;  %v652_v33 = vld [vmem:[#allocation7 + $0x180] sm:$0xff] }
  0x4a   :  { %881 = vmatmul.mubr.msk.f32.vlgmr.msra.gmra.mrb[2].mxu1 %vm72_vm1, %v1354_v15  ;;  %1068 = vmatpush3.bf16.msra.mxu0 %v1067_v31  ;;  %v404_v24 = vld [vmem:[#allocation5 + $0x70] sm:$0xff]  ;;  %v573_v31 = vld [vmem:[#allocation5 + $0x78] sm:$0xff]  ;;  %v491_v42 = vld [vmem:[#allocation7 + $0x140] sm:$0xff] }
  0x4b   :  { %1083 = vmatpush3.bf16.msra.mxu1 %v1082_v28  ;;  %950 = vmatprep.mubr.msk.f32.mxu1 %vm1278_vm0, %v1279_v1  ;;  %v1109_v26 = vpack.c.bf16 %v404_v24, %v403_v23  ;;  %v571_v28 = vld [vmem:[#allocation5 + $0x38] sm:$0xff]  ;;  %v1139_v32 = vpack.c.bf16 %v573_v31, %v572_v30  ;;  %v489_v36 = vld [vmem:[#allocation7 + $0x130] sm:$0xff]  ;;  %v492_v43 = vld [vmem:[#allocation7 + $0x148] sm:$0xff] }
  0x4c   :  { %1084 = vmatprep.subr.bf16.mxu1 %v1277_v0  ;;  %1069 = vmatprep.subr.bf16.mxu0 %v1277_v0  ;;  %v1136_v29 = vpack.c.bf16 %v571_v28, %v570_v27  ;;  %v655_v40 = vld [vmem:[#allocation7 + $0x198] sm:$0xff]  ;;  %v1124_v45 = vpack.c.bf16 %v492_v43, %v491_v42  ;;  %v657_v46 = vld [vmem:[#allocation7 + $0x1a8] sm:$0xff]  ;;  %v658_v48 = vld [vmem:[#allocation7 + $0x1b0] sm:$0xff] }
  0x4d   :  { %v495_v52 = vld [vmem:[#allocation7 + $0x160] sm:$0xff]  ;;  %v497_v58 = vld [vmem:[#allocation7 + $0x170] sm:$0xff]  ;;  %v665_v3 = vld [vmem:[#allocation7 + $0x1e8] sm:$0xff] }
  0x4e   :  { %1071 = vmatpush3.bf16.msra.mxu0 %v1070_v37  ;;  %v490_v37 = vld [vmem:[#allocation7 + $0x138] sm:$0xff]  ;;  %v660_v54 = vld [vmem:[#allocation7 + $0x1c0] sm:$0xff]  ;;  %v662_v60 = vld [vmem:[#allocation7 + $0x1d0] sm:$0xff] }
  0x4f   :  { %1086 = vmatpush3.bf16.msra.mxu1 %v1085_v34  ;;  %1072 = vmatprep.subr.bf16.mxu0 %v1277_v0  ;;  %v653_v34 = vld [vmem:[#allocation7 + $0x188] sm:$0xff]  ;;  %v1121_v39 = vpack.c.bf16 %v490_v37, %v489_v36  ;;  %v664_v2 = vld [vmem:[#allocation7 + $0x1e0] sm:$0xff]  ;;  %v768_v13 = vld [vmem:[%s1442_s2 + $0x2] ss:$0 sm:$0xff] }
  0x50   :  { %1087 = vmatprep.subr.bf16.mxu1 %v1277_v0  ;;  %v1142_v35 = vpack.c.bf16 %v653_v34, %v652_v33  ;;  %v772_v27 = vld [vmem:[%s1444_s4] ss:$0 sm:$0xff] }
  0x52   :  { %1074 = vmatpush3.bf16.msra.mxu0 %v1073_v53  ;;  %v496_v53 = vld [vmem:[#allocation7 + $0x168] sm:$0xff] }
  0x53   :  { %1089 = vmatpush3.bf16.msra.mxu1 %v1088_v38  ;;  %1075 = vmatprep.subr.bf16.mxu0 %v1277_v0  ;;  %v654_v38 = vld [vmem:[#allocation7 + $0x190] sm:$0xff]  ;;  %v1130_v55 = vpack.c.bf16 %v496_v53, %v495_v52 }
  0x54   :  { %1090 = vmatprep.subr.bf16.mxu1 %v1277_v0 }
  0x56   :  { %1077 = vmatpush3.bf16.msra.mxu0 %v1076_v59  ;;  %v498_v59 = vld [vmem:[#allocation7 + $0x178] sm:$0xff] }
  0x57   :  { %1092 = vmatpush3.bf16.msra.mxu1 %v1091_v41  ;;  %1078 = vmatprep.subr.bf16.mxu0 %v1277_v0  ;;  %v1145_v41 = vpack.c.bf16 %v655_v40, %v654_v38  ;;  %v1133_v61 = vpack.c.bf16 %v498_v59, %v497_v58 }
  0x58   :  { %1093 = vmatprep.subr.bf16.mxu1 %v1277_v0 }
  0x5a   :  { %1080 = vmatpush3.bf16.msra.mxu0 %v1079_v62  ;;  %v663_v62 = vld [vmem:[#allocation7 + $0x1d8] sm:$0xff] }
  0x5b   :  { %1095 = vmatpush3.bf16.msra.mxu1 %v1094_v44  ;;  %1105 = vmatprep.subr.bf16.mxu0 %v1277_v0  ;;  %v656_v44 = vld [vmem:[#allocation7 + $0x1a0] sm:$0xff] }
  0x5c   :  { %1096 = vmatprep.subr.bf16.mxu1 %v1277_v0 }
  0x5f   :  { %1098 = vmatpush3.bf16.msra.mxu1 %v1097_v47  ;;  %v494_v47 = vld [vmem:[#allocation7 + $0x158] sm:$0xff] }
  0x60   :  { %1099 = vmatprep.subr.bf16.mxu1 %v1277_v0 }
  0x63   :  { %1101 = vmatpush3.bf16.msra.mxu1 %v1100_v50  ;;  %v659_v50 = vld [vmem:[#allocation7 + $0x1b8] sm:$0xff] }
  0x64   :  { %1102 = vmatprep.subr.bf16.mxu1 %v1277_v0  ;;  %v1151_v51 = vpack.c.bf16 %v659_v50, %v658_v48 }
  0x67   :  { %1104 = vmatpush3.bf16.msra.mxu1 %v1103_v56  ;;  %v661_v56 = vld [vmem:[#allocation7 + $0x1c8] sm:$0xff] }
  0x68   :  { %1111 = vmatprep.subr.bf16.mxu1 %v1277_v0  ;;  %v1154_v57 = vpack.c.bf16 %v661_v56, %v660_v54 }
 0x115   :  { %v142_v4 = vpop.f32.mrb[0].mxu1 }
 0x116   :  { %v143_v5 = vadd.f32 %v764_v63, %v142_v4  ;;  %v871_v6 = vpop.f32.mrb[1].mxu1  ;;  %v1157_v63 = vpack.c.bf16 %v663_v62, %v662_v60  ;;  %v1160_v4 = vpack.c.bf16 %v665_v3, %v664_v2 }
 0x117   :  { %v667_v6 = vld [vmem:[#allocation7 + $0x1f8] sm:$0xff] }
 0x118   :  { %v146_v8 = vmax.f32 %v143_v5, 0.0  ;;  %v666_v5 = vld [vmem:[#allocation7 + $0x1f0] sm:$0xff] }
 0x11a   :  { %951 = vmatmul.mubr.f32.vlgmr.msra.gmra.mrb[4].mxu1 %v146_v8 }
 0x11b   :  { %1113 = vmatpush3.bf16.msra.mxu1 %v1112_v7  ;;  %996 = vmatprep.mubr.msk.f32.mxu1 %vm1278_vm0, %v1279_v1  ;;  %v1163_v7 = vpack.c.bf16 %v667_v6, %v666_v5 }
 0x11c   :  { %1114 = vmatprep.subr.bf16.mxu1 %v1277_v0 }
 0x11d   :  { %v240_v16 = vpop.f32.mrb[2].mxu1 }
 0x11e   :  { %v241_v19 = vadd.f32 %v766_v11, %v240_v16  ;;  %v882_v20 = vpop.f32.mrb[3].mxu1 }
 0x11f   :  { %1116 = vmatpush3.bf16.msra.mxu1 %v1115_v12 }
 0x120   :  { %v244_v22 = vmax.f32 %v241_v19, 0.0  ;;  %1117 = vmatprep.subr.bf16.mxu1 %v1277_v0 }
 0x122   :  { %916 = vmatmul.mubr.f32.vlgmr.msra.gmra.mrb[0].mxu0 %v244_v22 }
 0x123   :  { %1107 = vmatpush3.bf16.msra.mxu0 %v1106_v21  ;;  %961 = vmatprep.mubr.msk.f32.mxu0 %vm1278_vm0, %v1279_v1 }
 0x124   :  { %1108 = vmatprep.subr.bf16.mxu0 %v1277_v0  ;;  %1119 = vmatpush3.bf16.msra.mxu1 %v1118_v25 }
 0x125   :  { %1120 = vmatprep.subr.bf16.mxu1 %v1277_v0 }
 0x127   :  { %1110 = vmatpush3.bf16.msra.mxu0 %v1109_v26 }
 0x128   :  { %1135 = vmatprep.subr.bf16.mxu0 %v1277_v0  ;;  %1122 = vmatpush3.bf16.msra.mxu1 %v1121_v39 }
 0x129   :  { %1123 = vmatprep.subr.bf16.mxu1 %v1277_v0 }
 0x12a   :  { %962 = vmatmul.mubr.msk.f32.vlgmr.msra.gmra.mrb[2].mxu0 %vm72_vm1, %v1354_v15 }
 0x12b   :  { %1137 = vmatpush3.bf16.msra.mxu0 %v1136_v29  ;;  %1007 = vmatprep.mubr.msk.f32.mxu0 %vm1278_vm0, %v1279_v1 }
 0x12c   :  { %1138 = vmatprep.subr.bf16.mxu0 %v1277_v0  ;;  %1125 = vmatpush3.bf16.msra.mxu1 %v1124_v45 }
 0x12d   :  { %1126 = vmatprep.subr.bf16.mxu1 %v1277_v0 }
 0x12f   :  { %1140 = vmatpush3.bf16.msra.mxu0 %v1139_v32 }
 0x130   :  { %1141 = vmatprep.subr.bf16.mxu0 %v1277_v0 }
 0x132   :  { %1008 = vmatmul.mubr.msk.f32.vlgmr.msra.gmra.mrb[4].mxu0 %vm72_vm1, %v1354_v15  ;;  %v1148_v15 = vpack.c.bf16 %v657_v46, %v656_v44 }
 0x133   :  { %1143 = vmatpush3.bf16.msra.mxu0 %v1142_v35  ;;  %1042 = vmatprep.mubr.msk.f32.mxu0 %vm1278_vm0, %v1279_v1  ;;  %v493_v1 = vld [vmem:[#allocation7 + $0x150] sm:$0xff] }
 0x134   :  { %1144 = vmatprep.subr.bf16.mxu0 %v1277_v0  ;;  %v1127_v49 = vpack.c.bf16 %v494_v47, %v493_v1 }
 0x136   :  { %1128 = vmatpush3.bf16.msra.mxu1 %v1127_v49 }
 0x137   :  { %1146 = vmatpush3.bf16.msra.mxu0 %v1145_v41  ;;  %1129 = vmatprep.subr.bf16.mxu1 %v1277_v0 }
 0x138   :  { %1147 = vmatprep.subr.bf16.mxu0 %v1277_v0 }
 0x13a   :  { %1131 = vmatpush3.bf16.msra.mxu1 %v1130_v55 }
 0x13b   :  { %1149 = vmatpush3.bf16.msra.mxu0 %v1148_v15  ;;  %1132 = vmatprep.subr.bf16.mxu1 %v1277_v0 }
 0x13c   :  { %1150 = vmatprep.subr.bf16.mxu0 %v1277_v0 }
 0x13e   :  { %1134 = vmatpush3.bf16.msra.mxu1 %v1133_v61 }
 0x13f   :  { %1152 = vmatpush3.bf16.msra.mxu0 %v1151_v51 }
 0x140   :  { %1153 = vmatprep.subr.bf16.mxu0 %v1277_v0 }
 0x143   :  { %1155 = vmatpush3.bf16.msra.mxu0 %v1154_v57 }
 0x144   :  { %1156 = vmatprep.subr.bf16.mxu0 %v1277_v0 }
 0x147   :  { %1158 = vmatpush3.bf16.msra.mxu0 %v1157_v63 }
 0x148   :  { %1159 = vmatprep.subr.bf16.mxu0 %v1277_v0 }
 0x14b   :  { %1161 = vmatpush3.bf16.msra.mxu0 %v1160_v4 }
 0x14c   :  { %1162 = vmatprep.subr.bf16.mxu0 %v1277_v0  ;;  %v770_v0 = vld [vmem:[%s1442_s2 + $0x3] ss:$0 sm:$0xff]  ;;  %s1242_s2 = scalar_lea.vmem %s755_s16, 128 }
 0x14d   :  { %p1243_p10 = scmp.ne.s32.totalorder %s755_s16, %s1242_s2  ;;  %p1248_p12 = scmp.lt.s32.totalorder %s1242_s2, %s1242_s2 }
 0x14f   :  { %1164 = vmatpush3.bf16.msra.mxu0 %v1163_v7  ;;  %p1249_p13 = por %p1248_p12, %p1247_p11 }
 0x151   :  { %p1250_p0 = pnand %p1249_p13, %p1243_p10 }
 0x1ed   :  { %v397_v8 = vpop.f32.mrb[4].mxu1 }
 0x1ee   :  { %v952_v9 = vpop.f32.mrb[5].mxu1 }
 0x1f5   :  { %v327_v10 = vpop.f32.mrb[0].mxu0 }
 0x1f6   :  { %v398_v11 = vadd.f32 %v397_v8, %v327_v10  ;;  %v917_v12 = vpop.f32.mrb[1].mxu0 }
 0x1fd   :  { %v478_v14 = vpop.f32.mrb[2].mxu0 }
 0x1fe   :  { %v479_v16 = vadd.f32 %v768_v13, %v478_v14  ;;  %v963_v17 = vpop.f32.mrb[3].mxu0 }
 0x200   :  { %v482_v18 = vmax.f32 %v479_v16, 0.0 }
 0x202   :  { %997 = vmatmul.mubr.f32.vlgmr.msra.gmra.mrb[6].mxu1 %v482_v18 }
 0x205   :  { %v647_v19 = vpop.f32.mrb[4].mxu0 }
 0x206   :  { %v648_v20 = vadd.f32 %v770_v0, %v647_v19  ;;  %v1009_v21 = vpop.f32.mrb[5].mxu0 }
 0x208   :  { %v651_v22 = vmax.f32 %v648_v20, 0.0 }
 0x20a   :  { %1043 = vmatmul.mubr.f32.vlgmr.msra.gmra.mrb[6].mxu0 %v651_v22 }
 0x2d5   :  { %v565_v23 = vpop.f32.mrb[6].mxu1 }
 0x2d6   :  { %v569_v24 = vadd.f32 %v565_v23, %v398_v11  ;;  %v998_v25 = vpop.f32.mrb[7].mxu1 }
 0x2dd   :  { %v734_v26 = vpop.f32.mrb[6].mxu0 }
 0x2de   :  { %v738_v28 = vadd.f32 %v734_v26, %v569_v24  ;;  %v1044_v29 = vpop.f32.mrb[7].mxu0 }
 0x2e0   :  { %v746_v30 = vadd.f32 %v772_v27, %v738_v28 }
 0x2e2   :  { %747 = vst [vmem:[#allocation8] sm:$0xff] %v746_v30 }
 0x2e3   :  { %1253 = shalt.err (!%p1250_p0)
}
 0x2e4   :  { %s1254_s18 = scalar_lea.hbm %s1445_s5, 128 }
 0x2e5   :  { %p1255_p1 = scmp.ne.s32.totalorder %s1445_s5, %s1254_s18  ;;  %p1258_p2 = scmp.lt.u32.totalorder %s1254_s18, %s1445_s5 }
 0x2e7   :  { %p1260_p3 = pnand %p1258_p2, %p1255_p1 }
 0x2e9   :  { %1263 = shalt.err (!%p1260_p3)
}
 0x2ea   :  { %757 = dma.vmem_to_hbm [thread:$0]  %s755_s16, 128, %s1445_s5, [#allocation4]  }
 0x2eb   :  { %1268 = dma.done.wait [#allocation4], 128  }
 0x2ec   :  { %1269 = vsyncadd [#allocation4], 4294967168 }
 0x2ed   :  { %761 = vsyncpa [#allocation3], 1 }
 0x2ee   :  { %762 = vsyncpa [#allocation6], 1 }
 0x2ef   :  { %763 = vsyncpa [#allocation4], 1 }

</bundles_post_ra>
